<compile_context>
chip_gen: v7x
topology: tpu7x:2x2x1
jax: 0.10.0
libtpu: 0.0.40
codegen_flags: <defaults>
</compile_context>

<pallas_src>
import math

import jax
import jax.numpy as jnp
from jax.experimental import pallas as pl
from jax.experimental.pallas import tpu as pltpu

LOG_2PI_OVER_2 = math.log(2.0 * math.pi) / 2.0

_LANE = 128
_MAX_BLOCK_ROWS = 512          # multiple of 8 (f32 sublane)
_MAX_BLOCK_COLS = 1024         # multiple of 128 (lane); 2 MiB f32 tile max
_VMEM_LIMIT = 32 * 2**20       # > v5e's 16 MiB default, <= v7x's 64 MiB phys
_MEGACORE_MIN_ROWS = 64        # only split tiny grids when worth >1 step


def _round_up(x, m):
    return ((x + m - 1) // m) * m


def gaussian_logprob_kernel(x_ref, mean_ref, itv_ref, bias_ref, o_ref):
    # x_ref:    (bm, bc) tile of X
    # mean_ref: (1, bc)  broadcast over batch rows
    # itv_ref:  (1, bc)  precomputed 0.5 * exp(-2 * log_std)
    # bias_ref: (1, bc)  precomputed log_std + log(2*pi)/2
    x = x_ref[...].astype(jnp.float32)
    diff = x - mean_ref[...]
    energy = diff * diff * itv_ref[...] + bias_ref[...]
    o_ref[...] = (-energy).astype(o_ref.dtype)


def _run_tiled(x2d, mean_row, itv_row, bias_row, out_dtype):
    """Tiled elementwise log-prob over a 2-D array with (1, C) param rows."""
    R, C = x2d.shape

    # Column blocks: full extent when it fits (exempt from the 128 rule),
    # otherwise a 128-multiple block with cdiv boundary masking.
    block_cols = C if C <= _MAX_BLOCK_COLS else _MAX_BLOCK_COLS
    col_grid = pl.cdiv(C, block_cols)

    # Row blocks: multiple of 8 or full extent; split a would-be (1,1) grid in
    # two so v7x's second TensorCore gets work.
    if R <= _MAX_BLOCK_ROWS:
        if col_grid == 1 and R >= _MEGACORE_MIN_ROWS:
            block_rows = _round_up((R + 1) // 2, 8)
        else:
            block_rows = R
    else:
        block_rows = _MAX_BLOCK_ROWS
    row_grid = pl.cdiv(R, block_rows)

    return pl.pallas_call(
        gaussian_logprob_kernel,
        out_shape=jax.ShapeDtypeStruct((R, C), out_dtype),
        grid_spec=pltpu.PrefetchScalarGridSpec(
            num_scalar_prefetch=0,
            grid=(row_grid, col_grid),
            in_specs=[
                pl.BlockSpec((block_rows, block_cols), lambda i, j: (i, j)),
                pl.BlockSpec((1, block_cols), lambda i, j: (0, j)),
                pl.BlockSpec((1, block_cols), lambda i, j: (0, j)),
                pl.BlockSpec((1, block_cols), lambda i, j: (0, j)),
            ],
            out_specs=pl.BlockSpec((block_rows, block_cols), lambda i, j: (i, j)),
        ),
        compiler_params=pltpu.CompilerParams(
            dimension_semantics=("parallel", "parallel"),
            vmem_limit_bytes=_VMEM_LIMIT,
        ),
    )(x2d, mean_row, itv_row, bias_row)


def gaussian_log_prob(x, mean, log_std):
    """log_prob of a diagonal Gaussian, elementwise, via Pallas.

    x:       (N, D)
    mean:    (D,)
    log_std: (D,)
    returns: (N, D) with x.dtype
    """
    n, d = x.shape
    out_dtype = x.dtype

    # Hoisted parameter math (O(D), done once outside the kernel).
    mean_f32 = mean.astype(jnp.float32)
    log_std_f32 = log_std.astype(jnp.float32)
    inv_two_var = 0.5 * jnp.exp(-2.0 * log_std_f32)   # == 1 / (2 * exp(2*log_std))
    bias = log_std_f32 + LOG_2PI_OVER_2

    mean_row = mean_f32.reshape(1, d)
    itv_row = inv_two_var.reshape(1, d)
    bias_row = bias.reshape(1, d)

    if d >= _LANE:
        # D is lane-friendly enough; boundary (row/col) blocks are masked by
        # Pallas, so no wrapper-side padding or output slicing is needed.
        return _run_tiled(x, mean_row, itv_row, bias_row, out_dtype)

    # ---- D < 128: fold batch rows into the lane axis (lane-dense output) ----
    base = _LANE // math.gcd(d, _LANE)              # minimal fold for 128-mult
    lane_mult = max(1, _MAX_BLOCK_COLS // (base * d))
    row_mult = max(1, n // base)
    fold = base * min(lane_mult, row_mult)          # target ~_MAX_BLOCK_COLS lanes
    n_main = (n // fold) * fold

    if n_main == 0:
        # Tiny batch: run unfolded (full-extent blocks), still all in Pallas.
        return _run_tiled(x, mean_row, itv_row, bias_row, out_dtype)

    d_eff = fold * d
    mean_fold = jnp.tile(mean_f32, fold).reshape(1, d_eff)
    itv_fold = jnp.tile(inv_two_var, fold).reshape(1, d_eff)
    bias_fold = jnp.tile(bias, fold).reshape(1, d_eff)

    # Contiguous prefix slab -> folded view (reshape of a contiguous slab).
    x_main = x[:n_main].reshape(n_main // fold, d_eff)
    out_main = _run_tiled(x_main, mean_fold, itv_fold, bias_fold, out_dtype)
    out_main = out_main.reshape(n_main, d)

    if n_main == n:
        return out_main

    # Remainder (< fold rows): tiny separate kernel call, then concatenate.
    out_rem = _run_tiled(x[n_main:], mean_row, itv_row, bias_row, out_dtype)
    return jnp.concatenate([out_main, out_rem], axis=0)


def gaussian_log_prob_ref(x, mean, log_std):
    # Pure-JAX reference mirroring the PyTorch forward exactly.
    energy = (x - mean) ** 2 / (2.0 * jnp.exp(2.0 * log_std)) + LOG_2PI_OVER_2 + log_std
    return -energy


if __name__ == "__main__":
    key = jax.random.PRNGKey(0)
    kx, km, ks = jax.random.split(key, 3)

    batch, dim = 8, 32

    x = jax.random.normal(kx, (batch, dim), dtype=jnp.float32)
    # Module init is zeros; perturb slightly so exp / quadratic terms are exercised.
    mean = 0.1 * jax.random.normal(km, (dim,), dtype=jnp.float32)
    log_std = 0.1 * jax.random.normal(ks, (dim,), dtype=jnp.float32)

    out = jax.block_until_ready(gaussian_log_prob(x, mean, log_std))
    ref = gaussian_log_prob_ref(x, mean, log_std)
    assert out.shape == (batch, dim)
    assert jnp.allclose(out, ref, atol=1e-5, rtol=1e-5), "mismatch vs reference"

    # Extra shape checks exercising: fold + remainder, fold exact, D%128==0,
    # boundary-row masking, boundary-column masking, megacore row split,
    # tiny-batch unfolded fallback.
    for (b2, d2) in [(20, 48), (8, 32), (24, 256), (1040, 200),
                     (130, 1500), (256, 256), (7, 32), (3, 32)]:
        k2 = jax.random.fold_in(key, b2 * 10007 + d2)
        kx2, km2, ks2 = jax.random.split(k2, 3)
        x2 = jax.random.normal(kx2, (b2, d2), dtype=jnp.float32)
        m2 = 0.1 * jax.random.normal(km2, (d2,), dtype=jnp.float32)
        s2 = 0.1 * jax.random.normal(ks2, (d2,), dtype=jnp.float32)
        o2 = jax.block_until_ready(gaussian_log_prob(x2, m2, s2))
        r2 = gaussian_log_prob_ref(x2, m2, s2)
        assert o2.shape == (b2, d2)
        assert jnp.allclose(o2, r2, atol=1e-5, rtol=1e-5), f"mismatch at {(b2, d2)}"

    print("KERNEL_OK")
</pallas_src>

<mosaic_0001>
module attributes {stable_mosaic.version = 11 : i64} {
  func.func @gaussian_logprob_kernel(%arg0: i32, %arg1: i32, %arg2: memref<1x256xf32, #tpu.memory_space<vmem>>, %arg3: memref<1x256xf32, #tpu.memory_space<vmem>>, %arg4: memref<1x256xf32, #tpu.memory_space<vmem>>, %arg5: memref<1x256xf32, #tpu.memory_space<vmem>>, %arg6: memref<1x256xf32, #tpu.memory_space<vmem>>) attributes {dimension_semantics = [#tpu.dimension_semantics<parallel>, #tpu.dimension_semantics<parallel>], iteration_bounds = array<i64: 1, 1>, scalar_prefetch = 0 : i64, scratch_operands = 0 : i64, tpu.core_type = #tpu.core_type<tc>, window_params = [{transform_indices = @transform_0, window_bounds = array<i64: 1, 256>}, {transform_indices = @transform_1, window_bounds = array<i64: 1, 256>}, {transform_indices = @transform_2, window_bounds = array<i64: 1, 256>}, {transform_indices = @transform_3, window_bounds = array<i64: 1, 256>}, {transform_indices = @transform_4, window_bounds = array<i64: 1, 256>}]} {
    %c0 = arith.constant 0 : index
    %c0_0 = arith.constant 0 : index
    %0 = vector.load %arg2[%c0, %c0_0] : memref<1x256xf32, #tpu.memory_space<vmem>>, vector<1x256xf32>
    %c0_1 = arith.constant 0 : index
    %c0_2 = arith.constant 0 : index
    %1 = vector.load %arg3[%c0_1, %c0_2] : memref<1x256xf32, #tpu.memory_space<vmem>>, vector<1x256xf32>
    %2 = arith.subf %0, %1 : vector<1x256xf32>
    %3 = arith.mulf %2, %2 : vector<1x256xf32>
    %c0_3 = arith.constant 0 : index
    %c0_4 = arith.constant 0 : index
    %4 = vector.load %arg4[%c0_3, %c0_4] : memref<1x256xf32, #tpu.memory_space<vmem>>, vector<1x256xf32>
    %5 = arith.mulf %3, %4 : vector<1x256xf32>
    %c0_5 = arith.constant 0 : index
    %c0_6 = arith.constant 0 : index
    %6 = vector.load %arg5[%c0_5, %c0_6] : memref<1x256xf32, #tpu.memory_space<vmem>>, vector<1x256xf32>
    %7 = arith.addf %5, %6 : vector<1x256xf32>
    %cst = arith.constant 0.000000e+00 : f32
    %8 = vector.broadcast %cst : f32 to vector<1x256xf32>
    %9 = arith.subf %8, %7 : vector<1x256xf32>
    %c0_7 = arith.constant 0 : index
    %c0_8 = arith.constant 0 : index
    %10 = vector.load %arg6[%c0_7, %c0_8] : memref<1x256xf32, #tpu.memory_space<vmem>>, vector<1x256xf32>
    tpu.vector_store %arg6[%c0_7, %c0_8], %9 {strides = array<i32>} : memref<1x256xf32, #tpu.memory_space<vmem>>, vector<1x256xf32>,
    return
  }
  func.func @transform_0(%arg0: i32, %arg1: i32) -> (i32, i32) {
    %c0_i32 = arith.constant 0 : i32
    return %arg0, %arg1 : i32, i32
  }
  func.func @transform_1(%arg0: i32, %arg1: i32) -> (i32, i32) {
    %c0_i32 = arith.constant 0 : i32
    %c0_i32_0 = arith.constant 0 : i32
    return %c0_i32, %arg1 : i32, i32
  }
  func.func @transform_2(%arg0: i32, %arg1: i32) -> (i32, i32) {
    %c0_i32 = arith.constant 0 : i32
    %c0_i32_0 = arith.constant 0 : i32
    return %c0_i32, %arg1 : i32, i32
  }
  func.func @transform_3(%arg0: i32, %arg1: i32) -> (i32, i32) {
    %c0_i32 = arith.constant 0 : i32
    %c0_i32_0 = arith.constant 0 : i32
    return %c0_i32, %arg1 : i32, i32
  }
  func.func @transform_4(%arg0: i32, %arg1: i32) -> (i32, i32) {
    %c0_i32 = arith.constant 0 : i32
    return %arg0, %arg1 : i32, i32
  }
}

</mosaic_0001>

<bundles_post_ra>
// kernel: tpu_custom_call.1
= control target key start
LH: loop header
LB: loop body
LE: loop exit
PB: predicated region body
PF: predicated region fallthrough
CT: control target
= control target key end

     0   :  { %9 = vsyncpa [#allocation3], 0  ;;  %s169_s0 = inlined_call_operand.hbm [shape: f32[1,256], index: 0, kind: input, shape index: {}]   ;;  %s170_s1 = inlined_call_operand.vmem [shape: f32[1,256], index: 1, kind: input, shape index: {}]   ;;  %s171_s2 = inlined_call_operand.vmem [shape: f32[1,256], index: 2, kind: input, shape index: {}]   ;;  %s172_s3 = inlined_call_operand.vmem [shape: f32[1,256], index: 3, kind: input, shape index: {}]   ;;  %s173_s4 = inlined_call_operand.hbm [shape: f32[1,256], index: 4, kind: output, shape index: {}]  }
   0x1   :  { %10 = vsyncpa [#allocation4], 0  ;;  %s109_s15 = smov [#allocation2]   ;;  %s61_s19 = scalar_lea.hbm %s169_s0, 32 }
   0x2   :  { %s17_s16 = sshll.u32 %s109_s15, 4  ;;  %p62_p0 = scmp.ne.s32.totalorder %s169_s0, %s61_s19  ;;  %s18_s16 = int_to_ptr.vmem [resolvable:$true] %s17_s16 }
   0x3   :  { %p65_p1 = scmp.lt.u32.totalorder %s61_s19, %s169_s0 }
   0x5   :  { %p67_p2 = pnand %p65_p1, %p62_p0 }
   0x7   :  { %70 = shalt.err (!%p67_p2)
}
   0x8   :  { %s71_s24 = scalar_lea.vmem %s18_s16, 32  ;;  %p76_p4 = scmp.lt.s32.totalorder %s18_s16, %s18_s16 }
   0x9   :  { %p72_p3 = scmp.ne.s32.totalorder %s18_s16, %s71_s24  ;;  %p77_p5 = scmp.lt.s32.totalorder %s71_s24, %s71_s24 }
   0xb   :  { %p78_p6 = por %p77_p5, %p76_p4 }
   0xd   :  { %p79_p7 = pnand %p78_p6, %p72_p3 }
   0xf   :  { %82 = shalt.err (!%p79_p7)
}
  0x10   :  { %20 = dma.hbm_to_vmem [thread:$0]  %s169_s0, 32, %s18_s16, [#allocation3]  }
  0x11   :  { %105 = dma.done.wait [#allocation3], 32  }
  0x12   :  { %106 = vsyncadd [#allocation3], 4294967264  ;;  %v30_v0 = vld [vmem:[#allocation2] sm:$0x3]  ;;  %v39_v6 = vlaneseq  ;;  %s110_s0 = smov [#allocation5]  }
  0x13   :  { %v31_v1 = vld [vmem:[%s170_s1] sm:$0x3]  ;;  %s50_s7 = sshll.u32 %s110_s0, 4  ;;  %s51_s7 = int_to_ptr.vmem [resolvable:$true] %s50_s7 }
  0x14   :  { %v32_v2 = vsub.f32 %v30_v0, %v31_v1  ;;  %v34_v3 = vld [vmem:[%s171_s2] sm:$0x3]  ;;  %vm41_vm0 = vcmp.lt.s32.totalorder %v39_v6, 256  ;;  %s83_s1 = scalar_lea.vmem %s51_s7, 32  ;;  %p88_p9 = scmp.lt.s32.totalorder %s51_s7, %s51_s7 }
  0x15   :  { %v36_v5 = vld [vmem:[%s172_s3] sm:$0x3]  ;;  %p84_p8 = scmp.ne.s32.totalorder %s51_s7, %s83_s1  ;;  %p89_p10 = scmp.lt.s32.totalorder %s83_s1, %s83_s1 }
  0x16   :  { %v33_v4 = vmul.f32 %v32_v2, %v32_v2 }
  0x17   :  { %p90_p11 = por %p89_p10, %p88_p9 }
  0x18   :  { %v35_v7 = vmul.f32 %v34_v3, %v33_v4 }
  0x19   :  { %p91_p12 = pnand %p90_p11, %p84_p8 }
  0x1a   :  { %v37_v8 = vadd.f32 %v36_v5, %v35_v7 }
  0x1c   :  { %v38_v9 = vsub.f32 0.0, %v37_v8 }
  0x1e   :  { %43 = vst.msk [vmem:[#allocation5] sm:$0x3] %vm41_vm0, %v38_v9 }
  0x1f   :  { %94 = shalt.err (!%p91_p12)
}
  0x20   :  { %s95_s3 = scalar_lea.hbm %s173_s4, 32 }
  0x21   :  { %p96_p13 = scmp.ne.s32.totalorder %s173_s4, %s95_s3  ;;  %p99_p0 = scmp.lt.u32.totalorder %s95_s3, %s173_s4 }
  0x23   :  { %p101_p1 = pnand %p99_p0, %p96_p13 }
  0x25   :  { %104 = shalt.err (!%p101_p1)
}
  0x26   :  { %53 = dma.vmem_to_hbm [thread:$0]  %s51_s7, 32, %s173_s4, [#allocation4]  }
  0x27   :  { %107 = dma.done.wait [#allocation4], 32  }
  0x28   :  { %108 = vsyncadd [#allocation4], 4294967264 }
  0x29   :  { %57 = vsyncpa [#allocation3], 1 }
  0x2a   :  { %58 = vsyncpa [#allocation4], 1 }

</bundles_post_ra>
